<compile_context>
chip_gen: v6e
topology: v6e:2x2x1
jax: 0.10.0
libtpu: 0.0.40
codegen_flags: <defaults>
</compile_context>

<pallas_src>
import jax
import jax.numpy as jnp
from jax.experimental import pallas as pl
from jax.experimental.pallas import tpu as pltpu


# ----------------------------------------------------------------------------
# Kernel body (shared by both Pallas paths): pure VPU elementwise multiply.
# ----------------------------------------------------------------------------
def _mul_kernel(x2_ref, x3_ref, o_ref):
    o_ref[...] = x2_ref[...] * x3_ref[...]


_TINY_ELEMS = 1024                       # one f32 vreg worth of elements
_GRIDLESS_MAX_BYTES = 2 * 1024 * 1024    # per-operand cap for single-block path
_TARGET_TILE_BYTES = 4 * 1024 * 1024     # per pipeline buffer in the tiled path
_VMEM_LIMIT_BYTES = 48 * 1024 * 1024     # 3 operands x 2 bufs x 4 MiB = 24 MiB + headroom


def _round_up(x: int, m: int) -> int:
    return (x + m - 1) // m * m


def _mul_gridless(x2: jax.Array, x3: jax.Array) -> jax.Array:
    # Whole arrays as single VMEM blocks; no grid, no index_map.
    return pl.pallas_call(
        _mul_kernel,
        out_shape=jax.ShapeDtypeStruct(x2.shape, x2.dtype),
        in_specs=[
            pl.BlockSpec(memory_space=pltpu.MemorySpace.VMEM),
            pl.BlockSpec(memory_space=pltpu.MemorySpace.VMEM),
        ],
        out_specs=pl.BlockSpec(memory_space=pltpu.MemorySpace.VMEM),
    )(x2, x3)


def _mul_tiled(x2: jax.Array, x3: jax.Array, lane_cols: int) -> jax.Array:
    orig_shape = x2.shape
    n = x2.size
    rows = n // lane_cols

    # Contiguous row-major reshape: metadata-only, no extra HBM traffic.
    x2f = x2.reshape(rows, lane_cols)
    x3f = x3.reshape(rows, lane_cols)

    itemsize = x2.dtype.itemsize
    # Constant tile *bytes* across dtypes (~4 MiB/buffer), rows a multiple of 8.
    max_rows = max(8, (_TARGET_TILE_BYTES // (lane_cols * itemsize)) // 8 * 8)
    if rows <= 8:
        tile_rows = rows                      # single full-extent block
    else:
        # >= 2 tiles whenever possible (megacore sharding on v7x), capped at
        # the byte budget; ragged final tile handled by the cdiv grid.
        tile_rows = min(max_rows, _round_up(pl.cdiv(rows, 2), 8))
    grid = (pl.cdiv(rows, tile_rows),)

    out = pl.pallas_call(
        _mul_kernel,
        out_shape=jax.ShapeDtypeStruct((rows, lane_cols), x2.dtype),
        grid=grid,
        in_specs=[
            pl.BlockSpec((tile_rows, lane_cols), lambda i: (i, 0)),
            pl.BlockSpec((tile_rows, lane_cols), lambda i: (i, 0)),
        ],
        out_specs=pl.BlockSpec((tile_rows, lane_cols), lambda i: (i, 0)),
        compiler_params=pltpu.CompilerParams(
            dimension_semantics=("parallel",),
            vmem_limit_bytes=_VMEM_LIMIT_BYTES,
        ),
    )(x2f, x3f)

    return out.reshape(orig_shape)


def elementwise_mul(x2: jax.Array, x3: jax.Array) -> jax.Array:
    # PyTorch-style broadcasting + type promotion.
    out_shape = jnp.broadcast_shapes(x2.shape, x3.shape)
    out_dtype = jnp.result_type(x2.dtype, x3.dtype)
    x2 = jnp.broadcast_to(x2.astype(out_dtype), out_shape)
    x3 = jnp.broadcast_to(x3.astype(out_dtype), out_shape)

    n = x2.size
    itemsize = x2.dtype.itemsize

    if n <= _TINY_ELEMS:
        # Sub-vreg: launch overhead dominates; let XLA fuse the multiply.
        return x2 * x3

    # Lane-dense tiled path: pick the widest 128-multiple lane width dividing n.
    for lane_cols in (1024, 512, 256, 128):
        if n % lane_cols == 0:
            return _mul_tiled(x2, x3, lane_cols)

    if n * itemsize <= _GRIDLESS_MAX_BYTES:
        return _mul_gridless(x2, x3)

    # TODO(synk): large inputs whose flat size is not a multiple of 128 fall
    # back to plain XLA to avoid padding copies (extra HBM passes).
    return x2 * x3


class ModelPallas:
    """JAX/Pallas analogue of the PyTorch `Model` (elementwise x2 * x3)."""

    def __call__(self, x2: jax.Array, x3: jax.Array) -> jax.Array:
        return elementwise_mul(x2, x3)


if __name__ == "__main__":
    key = jax.random.PRNGKey(0)
    ks = jax.random.split(key, 6)
    model = ModelPallas()

    # (1) Module example shape (1, 2, 2): tiny path (fused plain multiply).
    a2 = jax.random.normal(ks[0], (1, 2, 2), dtype=jnp.float32)
    a3 = jax.random.normal(ks[1], (1, 2, 2), dtype=jnp.float32)
    out_a = jax.block_until_ready(model(a2, a3))
    assert jnp.allclose(out_a, a2 * a3, atol=1e-6), "tiny-path mismatch"

    # (2) Gridless single-block Pallas path: > 1 vreg, not 128-divisible.
    b2 = jax.random.normal(ks[2], (1, 40, 37), dtype=jnp.float32)
    b3 = jax.random.normal(ks[3], (1, 40, 37), dtype=jnp.float32)
    out_b = jax.block_until_ready(model(b2, b3))
    assert jnp.allclose(out_b, b2 * b3, atol=1e-6), "gridless-path mismatch"

    # (3) Lane-dense tiled Pallas path (>= 2 parallel row tiles, no padding).
    c2 = jax.random.normal(ks[4], (2, 256, 512), dtype=jnp.float32)
    c3 = jax.random.normal(ks[5], (2, 256, 512), dtype=jnp.float32)
    out_c = jax.block_until_ready(model(c2, c3))
    assert jnp.allclose(out_c, c2 * c3, atol=1e-6), "tiled-path mismatch"

    print("KERNEL_OK")
</pallas_src>

<mosaic_0001>
module attributes {stable_mosaic.version = 11 : i64} {
  func.func @_mul_kernel(%arg0: memref<1x40x37xf32, #tpu.memory_space<vmem>>, %arg1: memref<1x40x37xf32, #tpu.memory_space<vmem>>, %arg2: memref<1x40x37xf32, #tpu.memory_space<vmem>>) attributes {dimension_semantics = [], scalar_prefetch = 0 : i64, scratch_operands = 0 : i64, tpu.core_type = #tpu.core_type<tc>} {
    %c0 = arith.constant 0 : index
    %c0_0 = arith.constant 0 : index
    %c0_1 = arith.constant 0 : index
    %0 = vector.load %arg0[%c0, %c0_0, %c0_1] : memref<1x40x37xf32, #tpu.memory_space<vmem>>, vector<1x40x37xf32>
    %c0_2 = arith.constant 0 : index
    %c0_3 = arith.constant 0 : index
    %c0_4 = arith.constant 0 : index
    %1 = vector.load %arg1[%c0_2, %c0_3, %c0_4] : memref<1x40x37xf32, #tpu.memory_space<vmem>>, vector<1x40x37xf32>
    %2 = arith.mulf %0, %1 : vector<1x40x37xf32>
    %c0_5 = arith.constant 0 : index
    %c0_6 = arith.constant 0 : index
    %c0_7 = arith.constant 0 : index
    %3 = vector.load %arg2[%c0_5, %c0_6, %c0_7] : memref<1x40x37xf32, #tpu.memory_space<vmem>>, vector<1x40x37xf32>
    tpu.vector_store %arg2[%c0_5, %c0_6, %c0_7], %2 {strides = array<i32>} : memref<1x40x37xf32, #tpu.memory_space<vmem>>, vector<1x40x37xf32>,
    return
  }
}

</mosaic_0001>

<bundles_post_ra>
// kernel: tpu_custom_call.1
= control target key start
LH: loop header
LB: loop body
LE: loop exit
PB: predicated region body
PF: predicated region fallthrough
CT: control target
= control target key end

     0   :  { %vm26_vm0 = vcmask 302080   ;;  %s101_s0 = inlined_call_operand.vmem [shape: f32[1,40,37], index: 0, kind: input, shape index: {}]   ;;  %s102_s1 = inlined_call_operand.vmem [shape: f32[1,40,37], index: 1, kind: input, shape index: {}]   ;;  %s103_s2 = inlined_call_operand.vmem [shape: f32[1,40,37], index: 2, kind: output, shape index: {}]  }
   0x1   :  { %v11_v0 = vld [vmem:[%s101_s0] sm:$0xff]  ;;  %v12_v2 = vld [vmem:[%s101_s0 + $0x8] sm:$0xff]  ;;  %v13_v5 = vld [vmem:[%s101_s0 + $0x10] sm:$0xff] }
   0x2   :  { %v16_v1 = vld [vmem:[%s102_s1] sm:$0xff]  ;;  %v17_v4 = vld [vmem:[%s102_s1 + $0x8] sm:$0xff]  ;;  %v18_v6 = vld [vmem:[%s102_s1 + $0x10] sm:$0xff] }
   0x3   :  { %v21_v3 = vmul.f32 %v16_v1, %v11_v0  ;;  %v22_v7 = vmul.f32 %v17_v4, %v12_v2  ;;  %v23_v8 = vmul.f32 %v18_v6, %v13_v5  ;;  %v14_v9 = vld [vmem:[%s101_s0 + $0x18] sm:$0xff]  ;;  %v15_v11 = vld [vmem:[%s101_s0 + $0x20] sm:$0xff] }
   0x4   :  { %v19_v10 = vld [vmem:[%s102_s1 + $0x18] sm:$0xff]  ;;  %v20_v13 = vld [vmem:[%s102_s1 + $0x20] sm:$0xff] }
   0x5   :  { %27 = vst.msk [vmem:[%s103_s2] sm:$0xff] %vm26_vm0, %v21_v3  ;;  %v24_v12 = vmul.f32 %v19_v10, %v14_v9  ;;  %28 = vst.msk [vmem:[%s103_s2 + $0x8] sm:$0xff] %vm26_vm0, %v22_v7  ;;  %v25_v14 = vmul.f32 %v20_v13, %v15_v11 }
   0x6   :  { %29 = vst.msk [vmem:[%s103_s2 + $0x10] sm:$0xff] %vm26_vm0, %v23_v8 }
   0x7   :  { %30 = vst.msk [vmem:[%s103_s2 + $0x18] sm:$0xff] %vm26_vm0, %v24_v12  ;;  %31 = vst.msk [vmem:[%s103_s2 + $0x20] sm:$0xff] %vm26_vm0, %v25_v14 }

</bundles_post_ra>
